<compile_context>
chip_gen: v7x
topology: tpu7x:2x2x1
jax: 0.10.0
libtpu: 0.0.40
codegen_flags: <defaults>
</compile_context>

<pallas_src>
import math

import jax
import jax.numpy as jnp
from jax.experimental import pallas as pl
from jax.experimental.pallas import tpu as pltpu


# ---------------------------------------------------------------------------
# Kernel
# ---------------------------------------------------------------------------
def highway_kernel(x_ref, w_ref, b_ref, o_ref):
    e = x_ref.shape[-1]                               # padded embed (mult of 128)
    x = x_ref[...]                                    # native dtype (f32/bf16)

    # Fused proj+gate matmul: (tm, E) @ (E, 2E) -> (tm, 2E), f32 accumulate.
    h = jnp.dot(x, w_ref[...], preferred_element_type=jnp.float32)
    h = h + b_ref[...].astype(jnp.float32)

    x_proj = jnp.maximum(h[:, :e], 0.0)               # relu branch (VPU)
    x_gate = jax.nn.sigmoid(h[:, e:])                 # gate branch (EUP exp)

    xf = x.astype(jnp.float32)
    o_ref[...] = (xf + x_gate * (x_proj - xf)).astype(o_ref.dtype)


# ---------------------------------------------------------------------------
# Helpers
# ---------------------------------------------------------------------------
def _round_up(x, m):
    return ((x + m - 1) // m) * m


def _vmem_capacity_bytes():
    """Physical VMEM of the current chip; conservative fallback if unknown."""
    try:
        info = pltpu.get_tpu_info()
        cap = getattr(info, "vmem_capacity_bytes", None)
        if cap:
            return int(cap)
    except Exception:
        pass
    return 64 << 20  # v7x per-TC VMEM — the smallest of the three generations


def _pick_tm(n_rows, e_pad, x_itemsize, weight_bytes, budget_bytes):
    """Largest sublane-aligned row tile that fits the (generation-aware) budget."""
    per_row = (4 * e_pad * x_itemsize   # double-buffered x and out tiles
               + 16 * e_pad)            # ~2 live (row, 2*E) f32 temporaries
    avail = max(budget_bytes - weight_bytes, per_row * 8)
    tm = int(avail // per_row)
    tm = min(tm, 2048, _round_up(n_rows, 8))
    tm = max(8, (tm // 8) * 8)
    if tm >= 256:
        tm = (tm // 128) * 128          # lane/MXU-friendly row tile when large
    # Guarantee >= 2 grid steps so v7x's 2 TensorCores both get work.
    if n_rows > 8 and pl.cdiv(n_rows, tm) < 2:
        tm = max(8, _round_up(pl.cdiv(n_rows, 2), 8))
    return tm


def prepare_highway_params(w_proj, b_proj, w_gate, b_gate, dtype):
    """One-time (outside the hot path) fusion + lane padding of the parameters.

    w_*: (E, E) PyTorch layout (out, in).  b_*: (E,).
    Returns w_cat: (E_pad, 2*E_pad) in `dtype`, b_cat: (1, 2*E_pad) f32.
    """
    E = w_proj.shape[0]
    e_pad = _round_up(E, 128)
    wp = jnp.zeros((e_pad, e_pad), dtype).at[:E, :E].set(w_proj.T.astype(dtype))
    wg = jnp.zeros((e_pad, e_pad), dtype).at[:E, :E].set(w_gate.T.astype(dtype))
    w_cat = jnp.concatenate([wp, wg], axis=-1)                   # (E_pad, 2*E_pad)

    bp = jnp.zeros((1, e_pad), jnp.float32).at[0, :E].set(b_proj.astype(jnp.float32))
    bg = jnp.zeros((1, e_pad), jnp.float32).at[0, :E].set(b_gate.astype(jnp.float32))
    b_cat = jnp.concatenate([bp, bg], axis=-1)                   # (1, 2*E_pad)
    return w_cat, b_cat


# ---------------------------------------------------------------------------
# Wrapper
# ---------------------------------------------------------------------------
@jax.jit
def highway(x, w_cat, b_cat):
    """x: (..., E).  w_cat/b_cat: pre-fused, pre-padded (see prepare_highway_params)."""
    orig_shape = x.shape
    E = orig_shape[-1]
    e_pad = w_cat.shape[0]
    N = math.prod(orig_shape[:-1]) if len(orig_shape) > 1 else 1

    x2 = x.reshape(N, E)
    if E != e_pad:                                   # lane-dense padding (static)
        x2 = jnp.pad(x2, ((0, 0), (0, e_pad - E)))

    x_itemsize = jnp.dtype(x.dtype).itemsize
    weight_bytes = w_cat.size * jnp.dtype(w_cat.dtype).itemsize
    bias_bytes = b_cat.size * jnp.dtype(b_cat.dtype).itemsize

    cap = _vmem_capacity_bytes()
    budget = cap // 2                                # ~50% of physical VMEM
    if weight_bytes > budget:
        raise ValueError(
            "Fused highway weight does not fit the VMEM budget; embed size too "
            "large for the single-weight-resident kernel on this chip.")

    tm = _pick_tm(N, e_pad, x_itemsize, weight_bytes, budget)
    grid = (pl.cdiv(N, tm),)

    row_spec = pl.BlockSpec((tm, e_pad), lambda i: (i, 0))
    # Weights/bias are grid-invariant -> single-buffer them to save VMEM.
    w_spec = pl.BlockSpec((e_pad, 2 * e_pad), lambda i: (0, 0),
                          pipeline_mode=pl.Buffered(1))
    b_spec = pl.BlockSpec((1, 2 * e_pad), lambda i: (0, 0),
                          pipeline_mode=pl.Buffered(1))

    cost = pl.CostEstimate(
        flops=2 * N * e_pad * (2 * e_pad) + 6 * N * e_pad,
        transcendentals=N * e_pad,                   # sigmoid
        bytes_accessed=int(2 * N * e_pad * x_itemsize + weight_bytes + bias_bytes),
    )

    # VMEM actually needed per step: double-buffered row tiles, single-buffered
    # constants, ~2 live f32 temporaries of the fused-matmul width.
    vmem_need = (4 * tm * e_pad * x_itemsize
                 + weight_bytes + bias_bytes
                 + 2 * tm * 2 * e_pad * 4)
    vmem_limit = None
    if vmem_need >= (14 << 20):
        vmem_limit = int(min(max(2 * vmem_need, 16 << 20), 3 * cap // 4))

    out_pad = pl.pallas_call(
        highway_kernel,
        out_shape=jax.ShapeDtypeStruct((N, e_pad), x.dtype),
        grid_spec=pltpu.PrefetchScalarGridSpec(
            num_scalar_prefetch=0,
            grid=grid,
            in_specs=[row_spec, w_spec, b_spec],
            out_specs=row_spec,
        ),
        compiler_params=pltpu.CompilerParams(
            dimension_semantics=("parallel",),       # row tiles across TCs (v7x)
            vmem_limit_bytes=vmem_limit,
        ),
        cost_estimate=cost,
    )(x2, w_cat, b_cat)

    return out_pad[:, :E].reshape(orig_shape)


# ---------------------------------------------------------------------------
# Pure-JAX reference (PyTorch semantics, (out, in) weight layout)
# ---------------------------------------------------------------------------
def highway_ref(x, w_proj, b_proj, w_gate, b_gate):
    x_proj = jax.nn.relu(x @ w_proj.T + b_proj)
    x_gate = jax.nn.sigmoid(x @ w_gate.T + b_gate)
    return x_gate * x_proj + (1.0 - x_gate) * x


# ---------------------------------------------------------------------------
# Smoke test
# ---------------------------------------------------------------------------
if __name__ == "__main__":
    embed_size = 32
    batch, seq = 2, 8

    key = jax.random.PRNGKey(0)
    kx, kwp, kbp, kwg, kbg = jax.random.split(key, 5)

    x = jax.random.normal(kx, (batch, seq, embed_size), dtype=jnp.float32)
    w_proj = jax.random.normal(kwp, (embed_size, embed_size), jnp.float32) * 0.1
    b_proj = jax.random.normal(kbp, (embed_size,), jnp.float32) * 0.1
    w_gate = jax.random.normal(kwg, (embed_size, embed_size), jnp.float32) * 0.1
    b_gate = jax.random.normal(kbg, (embed_size,), jnp.float32) * 0.1

    # Parameter fusion/padding happens once, outside the per-call hot path.
    w_cat, b_cat = prepare_highway_params(w_proj, b_proj, w_gate, b_gate, x.dtype)

    out = jax.block_until_ready(highway(x, w_cat, b_cat))
    ref = highway_ref(x, w_proj, b_proj, w_gate, b_gate)

    assert out.shape == x.shape
    assert jnp.allclose(out, ref, atol=1e-5, rtol=1e-5), "mismatch vs reference"
    print("KERNEL_OK")
</pallas_src>

<mosaic_0001>
module attributes {stable_mosaic.version = 11 : i64} {
  func.func @highway_kernel(%arg0: i32, %arg1: memref<8x128xf32, #tpu.memory_space<vmem>>, %arg2: memref<128x256xf32, #tpu.memory_space<vmem>>, %arg3: memref<1x256xf32, #tpu.memory_space<vmem>>, %arg4: memref<8x128xf32, #tpu.memory_space<vmem>>) attributes {dimension_semantics = [#tpu.dimension_semantics<parallel>], iteration_bounds = array<i64: 2>, scalar_prefetch = 0 : i64, scratch_operands = 0 : i64, tpu.core_type = #tpu.core_type<tc>, window_params = [{transform_indices = @transform_0, window_bounds = array<i64: 8, 128>}, {pipeline_mode = #tpu.pipeline_mode<synchronous>, transform_indices = @transform_1, window_bounds = array<i64: 128, 256>}, {pipeline_mode = #tpu.pipeline_mode<synchronous>, transform_indices = @transform_2, window_bounds = array<i64: 1, 256>}, {transform_indices = @transform_3, window_bounds = array<i64: 8, 128>}]} {
    %c0 = arith.constant 0 : index
    %c0_0 = arith.constant 0 : index
    %0 = vector.load %arg1[%c0, %c0_0] : memref<8x128xf32, #tpu.memory_space<vmem>>, vector<8x128xf32>
    %c0_1 = arith.constant 0 : index
    %c0_2 = arith.constant 0 : index
    %1 = vector.load %arg2[%c0_1, %c0_2] : memref<128x256xf32, #tpu.memory_space<vmem>>, vector<128x256xf32>
    %cst = arith.constant dense<0.000000e+00> : vector<8x256xf32>
    %2 = tpu.matmul %0, %1, %cst {dimension_numbers = #tpu.dot_dimension_numbers<[1], [0], [0], [1], [0, 0, 1, 1], [], []>} : vector<8x128xf32>, vector<128x256xf32>, vector<8x256xf32> -> vector<8x256xf32>
    %c0_3 = arith.constant 0 : index
    %c0_4 = arith.constant 0 : index
    %3 = vector.load %arg3[%c0_3, %c0_4] : memref<1x256xf32, #tpu.memory_space<vmem>>, vector<1x256xf32>
    %4 = vector.broadcast %3 : vector<1x256xf32> to vector<8x256xf32>
    %5 = arith.addf %2, %4 : vector<8x256xf32>
    %6 = vector.extract_strided_slice %5 {offsets = [0, 0], sizes = [8, 128], strides = [1, 1]} : vector<8x256xf32> to vector<8x128xf32>
    %cst_5 = arith.constant 0.000000e+00 : f32
    %7 = vector.broadcast %cst_5 : f32 to vector<8x128xf32>
    %8 = arith.maximumf %6, %7 : vector<8x128xf32>
    %9 = vector.extract_strided_slice %5 {offsets = [0, 128], sizes = [8, 128], strides = [1, 1]} : vector<8x256xf32> to vector<8x128xf32>
    %10 = arith.negf %9 : vector<8x128xf32>
    %11 = math.exp %10 : vector<8x128xf32>
    %cst_6 = arith.constant 1.000000e+00 : f32
    %12 = vector.broadcast %cst_6 : f32 to vector<8x128xf32>
    %13 = arith.addf %12, %11 : vector<8x128xf32>
    %14 = arith.divf %12, %13 : vector<8x128xf32>
    %15 = arith.subf %8, %0 : vector<8x128xf32>
    %16 = arith.mulf %14, %15 : vector<8x128xf32>
    %17 = arith.addf %0, %16 : vector<8x128xf32>
    %c0_7 = arith.constant 0 : index
    %c0_8 = arith.constant 0 : index
    %18 = vector.load %arg4[%c0_7, %c0_8] : memref<8x128xf32, #tpu.memory_space<vmem>>, vector<8x128xf32>
    tpu.vector_store %arg4[%c0_7, %c0_8], %17 {strides = array<i32>} : memref<8x128xf32, #tpu.memory_space<vmem>>, vector<8x128xf32>,
    return
  }
  func.func @transform_0(%arg0: i32) -> (i32, i32) {
    %c0_i32 = arith.constant 0 : i32
    %c0_i32_0 = arith.constant 0 : i32
    return %arg0, %c0_i32 : i32, i32
  }
  func.func @transform_1(%arg0: i32) -> (i32, i32) {
    %c0_i32 = arith.constant 0 : i32
    %c0_i32_0 = arith.constant 0 : i32
    %c0_i32_1 = arith.constant 0 : i32
    return %c0_i32, %c0_i32_0 : i32, i32
  }
  func.func @transform_2(%arg0: i32) -> (i32, i32) {
    %c0_i32 = arith.constant 0 : i32
    %c0_i32_0 = arith.constant 0 : i32
    %c0_i32_1 = arith.constant 0 : i32
    return %c0_i32, %c0_i32_0 : i32, i32
  }
  func.func @transform_3(%arg0: i32) -> (i32, i32) {
    %c0_i32 = arith.constant 0 : i32
    %c0_i32_0 = arith.constant 0 : i32
    return %arg0, %c0_i32 : i32, i32
  }
}

</mosaic_0001>

<bundles_post_ra>
// kernel: highway.1
= control target key start
LH: loop header
LB: loop body
LE: loop exit
PB: predicated region body
PF: predicated region fallthrough
CT: control target
= control target key end

     0   :  { %8 = vsyncpa [#allocation3], 0  ;;  %s507_s12 = smov 0   ;;  %s569_s0 = inlined_call_operand.vmem [shape: f32[16,128], index: 0, kind: input, shape index: {}]   ;;  %s570_s1 = inlined_call_operand.hbm [shape: f32[128,256], index: 1, kind: input, shape index: {}]   ;;  %s571_s2 = inlined_call_operand.vmem [shape: f32[1,256], index: 2, kind: input, shape index: {}]   ;;  %s572_s3 = inlined_call_operand.vmem [shape: f32[16,128], index: 3, kind: output, shape index: {}]  }
   0x1 LB: > { %s513_s13 = sadd.s32 4294967295, %s481_s12   ;;  %p375_p0 = scmp.ge.s32.totalorder %s481_s12, 1  ;;  %s481_s12 = sphi %s507_s12, %s14_s12  }
   0x2   : > { %p113_p1 = scmp.lt.s32.totalorder %s481_s12, 3  ;;  %s483_s14 = smov [#allocation2]  }
   0x3   : > { %s125_s15 = sshll.u32 %s483_s14, 4  ;;  %p573_p3 = scmp.eq.s32.totalorder %s513_s13, 0  ;;  %s126_s15 = int_to_ptr.vmem [resolvable:$true] %s125_s15 }
   0x4   : > { %p517_p2 = pnand %p375_p0, %p113_p1  ;;  %s443_s20 = scalar_lea.hbm %s570_s1, 4096 }
   0x5   : > { %p444_p6 = scmp.ne.s32.totalorder %s570_s1, %s443_s20  ;;  %p450_p10 = scmp.lt.u32.totalorder %s443_s20, %s570_s1 }
   0x6   : > { %s575_s16 = scalar_select %p517_p2, 1, 0 }
   0x7   : > { %p421_p4 = pneg %p517_p2 }
   0x9   : > { %p526_p5 = pnand %p573_p3, %p421_p4 }
   0xb   : > { %p445_p7 = pneg %p526_p5 }
   0xd   : > { %p446_p8 = pnand %p445_p7, %p444_p6 }
   0xf   : > { %p447_p9 = pneg %p446_p8 }
  0x11   : > { %p452_p11 = pnand %p450_p10, %p447_p9 }
  0x13   : > { %455 = shalt.err (!%p452_p11)
}
  0x14   : > { %s456_s25 = scalar_lea.vmem %s126_s15, 4096  ;;  %p464_p1 = scmp.lt.s32.totalorder %s126_s15, %s126_s15 }
  0x15   : > { %p457_p12 = scmp.ne.s32.totalorder %s126_s15, %s456_s25  ;;  %p465_p4 = scmp.lt.s32.totalorder %s456_s25, %s456_s25 }
  0x17   : > { %p459_p13 = pnand %p457_p12, %p445_p7  ;;  %p466_p3 = por %p465_p4, %p464_p1 }
  0x19   : > { %p460_p0 = pneg %p459_p13 }
  0x1b   : > { %p467_p2 = pnand %p466_p3, %p460_p0 }
  0x1d   : > { %470 = shalt.err (!%p467_p2)
}
  0x1e   : > { %s484_s26 = smov 256   ;;  %s485_s27 = smov 16  }
  0x1f   : > { %424 = dma.hbm_to_vmem [thread:$0]  (!%p526_p5), %s570_s1, 4096, %s126_s15, [#allocation3], %s484_s26, %s484_s26, %s485_s27  }
  0x20   : > { %p577_p6 = scmp.ne.s32.totalorder %s575_s16, 0 }
  0x21   : > { %p578_p8 = scmp.eq.s32.totalorder (!%p577_p6), %s513_s13, 0 }
  0x22   : > { %151 = sbr.rel (%p577_p6) target bundleno = 323 (0x143), region = 32 }
  0x29   : > { %476 = dma.done.wait (%p578_p8), [#allocation3], 4096   ;;  %p579_p7 = pmov %p578_p8 }
  0x2a   : > { %v486_v0 = vmov 0.0   ;;  %v183_v1 = vld [vmem:[#allocation2 + $0x8] sm:$0xff]  ;;  %v185_v2 = vld [vmem:[#allocation2 + $0x18] sm:$0xff]  ;;  %v182_v3 = vld [vmem:[#allocation2] sm:$0xff]  ;;  %p173_p2 = scmp.lt.s32.totalorder %s513_s13, 1  ;;  %v216_v50 = vlaneseq }
  0x2b   : > { %478 = vsyncadd (%p579_p7), [#allocation3], 4294963200  ;;  %290 = vmatprep.mubr.f32.mxu0 %v486_v0  ;;  %v385_v4 = vpack.c.bf16 %v185_v2, %v183_v1  ;;  %v184_v5 = vld [vmem:[#allocation2 + $0x10] sm:$0xff]  ;;  %v187_v6 = vld [vmem:[#allocation2 + $0x28] sm:$0xff] }
  0x2c   : > { %v189_v7 = vld [vmem:[#allocation2 + $0x38] sm:$0xff]  ;;  %v387_v8 = vpack.c.bf16 %v184_v5, %v182_v3  ;;  %v186_v10 = vld [vmem:[#allocation2 + $0x20] sm:$0xff]  ;;  %v188_v11 = vld [vmem:[#allocation2 + $0x30] sm:$0xff]  ;;  %s581_s13 = smov (!%p173_p2, %s513_s13), 1  ;;  %v217_v51 = vshrl.u32 %v216_v50, 7 }
  0x2d   : > { %v389_v9 = vpack.c.bf16 %v189_v7, %v187_v6  ;;  %v191_v12 = vld [vmem:[#allocation2 + $0x48] sm:$0xff]  ;;  %386 = vmatprep.subr.bf16.mxu0 %v385_v4  ;;  %v193_v13 = vld [vmem:[#allocation2 + $0x58] sm:$0xff]  ;;  %v391_v14 = vpack.c.bf16 %v188_v11, %v186_v10  ;;  %v190_v16 = vld [vmem:[#allocation2 + $0x40] sm:$0xff]  ;;  %s380_s30 = sshll.u32 %s581_s13, 3 }
  0x2e   : > { %388 = vmatpush1.bf16.msra.mxu0 %v387_v8  ;;  %v393_v15 = vpack.c.bf16 %v193_v13, %v191_v12  ;;  %v192_v17 = vld [vmem:[#allocation2 + $0x50] sm:$0xff]  ;;  %v195_v18 = vld [vmem:[#allocation2 + $0x68] sm:$0xff]  ;;  %v197_v19 = vld [vmem:[#allocation2 + $0x78] sm:$0xff]  ;;  %s176_s6 = scalar_lea.vmem %s569_s0, %s380_s30  ;;  %v222_v52 = vsub.s32 1, %v217_v51  ;;  %v218_v59 = vsub.s32 0, %v217_v51  ;;  %s180_s11 = scalar_lea.vmem %s572_s3, %s380_s30 }
  0x2f   : > { %390 = vmatprep.subr.bf16.mxu0 %v389_v9  ;;  %v395_v20 = vpack.c.bf16 %v192_v17, %v190_v16  ;;  %v397_v21 = vpack.c.bf16 %v197_v19, %v195_v18  ;;  %v194_v22 = vld [vmem:[#allocation2 + $0x60] sm:$0xff]  ;;  %v196_v23 = vld [vmem:[#allocation2 + $0x70] sm:$0xff]  ;;  %v199_v24 = vld [vmem:[#allocation2 + $0x88] sm:$0xff] }
  0x30   : > { %v201_v25 = vld [vmem:[#allocation2 + $0x98] sm:$0xff]  ;;  %v399_v26 = vpack.c.bf16 %v196_v23, %v194_v22  ;;  %v198_v28 = vld [vmem:[#allocation2 + $0x80] sm:$0xff]  ;;  %v200_v29 = vld [vmem:[#allocation2 + $0x90] sm:$0xff] }
  0x31   : > { %v401_v27 = vpack.c.bf16 %v201_v25, %v199_v24  ;;  %v203_v30 = vld [vmem:[#allocation2 + $0xa8] sm:$0xff]  ;;  %v205_v31 = vld [vmem:[#allocation2 + $0xb8] sm:$0xff]  ;;  %v403_v32 = vpack.c.bf16 %v200_v29, %v198_v28  ;;  %v202_v34 = vld [vmem:[#allocation2 + $0xa0] sm:$0xff] }
  0x32   : > { %392 = vmatpush1.bf16.msra.mxu0 %v391_v14  ;;  %v405_v33 = vpack.c.bf16 %v205_v31, %v203_v30  ;;  %v204_v35 = vld [vmem:[#allocation2 + $0xb0] sm:$0xff]  ;;  %v207_v36 = vld [vmem:[#allocation2 + $0xc8] sm:$0xff]  ;;  %v209_v37 = vld [vmem:[#allocation2 + $0xd8] sm:$0xff] }
  0x33   : > { %394 = vmatprep.subr.bf16.mxu0 %v393_v15  ;;  %v407_v38 = vpack.c.bf16 %v204_v35, %v202_v34  ;;  %v409_v39 = vpack.c.bf16 %v209_v37, %v207_v36  ;;  %v206_v40 = vld [vmem:[#allocation2 + $0xc0] sm:$0xff]  ;;  %v208_v41 = vld [vmem:[#allocation2 + $0xd0] sm:$0xff]  ;;  %v211_v42 = vld [vmem:[#allocation2 + $0xe8] sm:$0xff] }
  0x34   : > { %v213_v43 = vld [vmem:[#allocation2 + $0xf8] sm:$0xff]  ;;  %v411_v44 = vpack.c.bf16 %v208_v41, %v206_v40  ;;  %v210_v46 = vld [vmem:[#allocation2 + $0xe0] sm:$0xff]  ;;  %v212_v47 = vld [vmem:[#allocation2 + $0xf0] sm:$0xff] }
  0x35   : > { %v413_v45 = vpack.c.bf16 %v213_v43, %v211_v42  ;;  %v415_v48 = vpack.c.bf16 %v212_v47, %v210_v46  ;;  %v181_v49 = vld [vmem:[%s176_s6] sm:$0xff] }
  0x36   : > { %396 = vmatpush1.bf16.msra.mxu0 %v395_v20  ;;  %v214_v53 = vld [vmem:[%s571_s2] sm:$0x3] }
  0x37   : > { %398 = vmatprep.subr.bf16.mxu0 %v397_v21  ;;  %v223_v54 = vrot.slane %v214_v53, %v222_v52  ;;  %v219_v61 = vrot.slane %v214_v53, %v218_v59 }
  0x3a   : > { %400 = vmatpush1.bf16.msra.mxu0 %v399_v26 }
  0x3b   : > { %402 = vmatprep.subr.bf16.mxu0 %v401_v27 }
  0x3e   : > { %404 = vmatpush1.bf16.msra.mxu0 %v403_v32 }
  0x3f   : > { %406 = vmatprep.subr.bf16.mxu0 %v405_v33 }
  0x42   : > { %408 = vmatpush1.bf16.msra.mxu0 %v407_v38 }
  0x43   : > { %410 = vmatprep.subr.bf16.mxu0 %v409_v39 }
  0x46   : > { %412 = vmatpush1.bf16.msra.mxu0 %v411_v44 }
  0x47   : > { %414 = vmatprep.subr.bf16.mxu0 %v413_v45 }
  0x4a   : > { %416 = vmatpush1.bf16.msra.mxu0 %v415_v48 }
  0x4d   : > { %291 = vmatmul.mubr.f32.vlgmr.msra.gmra.mrb[0].mxu0 %v181_v49 }
 0x120   : > { %v292_v55 = vpop.f32.mrb[0].mxu0 }
 0x121   : > { %v294_v56 = vpop.f32.mrb[1].mxu0  ;;  %v293_v63 = vadd.f32 %v292_v55, %v219_v61 }
 0x122   : > { %v295_v57 = vadd.f32 %v294_v56, %v223_v54 }
 0x123   : > { %v297_v0 = vmax.f32 %v293_v63, 0.0 }
 0x124   : > { %v382_v58 = vmul.f32 -1.442695, %v295_v57 }
 0x125   : > { %v304_v1 = vsub.f32 %v297_v0, %v181_v49 }
 0x126   : > { %439 = vpow2.f32 %v382_v58 }
 0x130   : > { %v440_v60 = vpop.eup %439 }
 0x131   : > { %v301_v62 = vadd.f32 1.0, %v440_v60 }
 0x133   : > { %441 = vrcp.f32 %v301_v62 }
 0x13d   : > { %v442_v2 = vpop.eup %441 }
 0x13e   : > { %v305_v3 = vmul.f32 %v442_v2, %v304_v1 }
 0x140   : > { %v306_v4 = vadd.f32 %v305_v3, %v181_v49 }
 0x142   : > { %307 = vst [vmem:[%s180_s11] sm:$0xff] %v306_v4 }
 0x143 PF: > { %s14_s12 = sadd.s32 1, %s481_s12  }
 0x144   : > { %p11_p3 = scmp.ge.s32.totalorder %s14_s12, 4  }
 0x146   :  { %13 = sbr.rel (!%p11_p3) target bundleno = 1 (0x1), region = 67 }
 0x14d   :  { %327 = vsyncpa [#allocation3], 1 }
 0x14e   :  { %329 = vsyncpa [#allocation3 + $0x1], 1 }

</bundles_post_ra>
